<compile_context>
chip_gen: v7x
topology: tpu7x:2x2x1
jax: 0.10.0
libtpu: 0.0.40
codegen_flags: <defaults>
</compile_context>

<pallas_src>
import functools

import jax
import jax.numpy as jnp
from jax.experimental import pallas as pl
from jax.experimental.pallas import tpu as pltpu


def _pick_channel_batch(nc, bytes_per_channel, target_bytes=2 * 1024 * 1024):
    """Largest divisor of nc giving ~target_bytes activation tiles.

    Keeps the block's second-minor dim a multiple of 8 (or the full extent) so
    the (8, 128) tiling rule holds, and prefers leaving >= 2 grid steps so the
    'parallel' axis can be split across TensorCores.
    """
    max_b = max(1, target_bytes // max(1, bytes_per_channel))
    divisors = [d for d in range(1, nc + 1) if nc % d == 0]
    legal = [d for d in divisors if d % 8 == 0 or d == nc]
    fitting = [d for d in legal if d <= max_b] or [min(legal)]
    multi_step = [d for d in fitting if nc // d >= 2]
    return max(multi_step) if multi_step else max(fitting)


def _lrp_avgpool_kernel(a_ref, r_ref, pool_ref, up_ref, o_ref, *,
                        k, hp, width, wp, eps_kk):
    """One grid step: B channel images, flattened to (B, H*W).

    a_ref:    (B, H*W)   activations (NCHW row-major, lane-dense)
    r_ref:    (B, Hp*Wp) relevance of the pooled layer
    pool_ref: (W, W)     0/1 "sum my k-wide window, broadcast back" matrix
    up_ref:   (Wp, W)    0/1 "replicate each pooled column k times" matrix
    o_ref:    (B, H*W)   redistributed relevance
    """
    a = a_ref[...].astype(jnp.float32)        # load the whole tile once
    r = r_ref[...].astype(jnp.float32)
    pool_w = pool_ref[...]                    # tiny f32 constants in VMEM
    up_w = up_ref[...]

    kw = k * width
    segs = []
    for p in range(hp):                       # static unroll over pooled rows
        base = p * kw
        # The k image rows of this pooling-window row (lane slices of the
        # already-loaded tile).
        rows = [a[:, base + i * width: base + (i + 1) * width]
                for i in range(k)]
        # Window sum along W, broadcast back to full W resolution.  Raw rows
        # go straight into the MXU (0/1 matrix, f32 accumulation -> exact for
        # bf16-representable inputs); the k H-positions are summed on the VPU.
        zs_up = jnp.dot(rows[0], pool_w, preferred_element_type=jnp.float32)
        for row in rows[1:]:
            zs_up = zs_up + jnp.dot(row, pool_w,
                                    preferred_element_type=jnp.float32)
        # Upsample r along W (pure 0/1 copy matmul).
        r_row = r[:, p * wp: (p + 1) * wp]
        r_up = jnp.dot(r_row, up_w, preferred_element_type=jnp.float32)
        # z = zs/(k*k) + eps ; s = r/z ; c = s/(k*k)  ==>  c = r/(zs + eps*k*k)
        c = r_up / (zs_up + eps_kk)
        for i in range(k):
            segs.append(rows[i] * c)

    # Single dense, lane-wide store of the whole output tile.
    o_ref[...] = jnp.concatenate(segs, axis=1).astype(o_ref.dtype)


def lrp_maxpool2d_avg(a, r, *, kernel_size=2, eps=1e-5):
    """Forward of RelevancePropagationMaxPool2d (mode='avg', top_k=0.0).

    a: (N, C, H, W) activations (NCHW, like PyTorch)
    r: (N, C, H//k, W//k) relevance from the layer above
    returns: (N, C, H, W) relevance, same dtype as a.
    """
    k = kernel_size
    N, C, H, W = a.shape
    Hp, Wp = H // k, W // k
    assert H % k == 0 and W % k == 0
    assert r.shape == (N, C, Hp, Wp)

    NC = N * C
    HW = H * W

    # Free, contiguous reshapes only (no transpose passes over HBM).
    a2 = a.reshape(NC, HW)
    r2 = r.reshape(NC, Hp * Wp)

    # Tiny 0/1 selection matrices for the W direction (built once, live in VMEM).
    wi = jnp.arange(W, dtype=jnp.int32)
    qi = jnp.arange(Wp, dtype=jnp.int32)
    pool_w = ((wi[:, None] // k) == (wi[None, :] // k)).astype(jnp.float32)
    up_w = (qi[:, None] == (wi[None, :] // k)).astype(jnp.float32)

    B = _pick_channel_batch(NC, HW * a.dtype.itemsize)
    grid = (NC // B,)

    kern = functools.partial(_lrp_avgpool_kernel, k=k, hp=Hp, width=W, wp=Wp,
                             eps_kk=float(eps) * k * k)

    out2 = pl.pallas_call(
        kern,
        out_shape=jax.ShapeDtypeStruct((NC, HW), a.dtype),
        grid=grid,
        in_specs=[
            pl.BlockSpec((B, HW), lambda i: (i, 0)),
            pl.BlockSpec((B, Hp * Wp), lambda i: (i, 0)),
            pl.BlockSpec((W, W), lambda i: (0, 0)),
            pl.BlockSpec((Wp, W), lambda i: (0, 0)),
        ],
        out_specs=pl.BlockSpec((B, HW), lambda i: (i, 0)),
        compiler_params=pltpu.CompilerParams(
            dimension_semantics=("parallel",)),
    )(a2, r2, pool_w, up_w)

    return out2.reshape(N, C, H, W)


if __name__ == "__main__":
    key = jax.random.PRNGKey(0)
    k1, k2 = jax.random.split(key)

    N, C, H, W = 2, 4, 16, 16
    kpool = 2
    eps = 1e-5

    # Positive activations (post-ReLU style, as in the LRP use case).
    a = jax.random.uniform(k1, (N, C, H, W), dtype=jnp.float32) + 0.1
    r = jax.random.uniform(k2, (N, C, H // kpool, W // kpool),
                           dtype=jnp.float32)
    # Quantize the test inputs to bf16-representable f32 values so the check
    # below stays exact regardless of the MXU's input precision for f32 dots.
    a = a.astype(jnp.bfloat16).astype(jnp.float32)
    r = r.astype(jnp.bfloat16).astype(jnp.float32)

    out = lrp_maxpool2d_avg(a, r, kernel_size=kpool, eps=eps)
    out = jax.block_until_ready(out)

    # Pure-JAX reference of the PyTorch forward (avg-pool mode).
    z = jax.lax.reduce_window(a, 0.0, jax.lax.add,
                              (1, 1, kpool, kpool),
                              (1, 1, kpool, kpool), "VALID") / (kpool * kpool)
    z = z + eps
    s = r / z
    c = jnp.repeat(jnp.repeat(s, kpool, axis=2), kpool, axis=3) / (kpool * kpool)
    ref = a * c

    assert out.shape == a.shape and out.dtype == a.dtype
    assert jnp.allclose(out, ref, rtol=1e-4, atol=1e-6)
    print("KERNEL_OK")
</pallas_src>

<mosaic_0001>
module attributes {stable_mosaic.version = 11 : i64} {
  func.func @_lrp_avgpool_kernel(%arg0: i32, %arg1: memref<8x256xf32, #tpu.memory_space<vmem>>, %arg2: memref<8x64xf32, #tpu.memory_space<vmem>>, %arg3: memref<16x16xf32, #tpu.memory_space<vmem>>, %arg4: memref<8x16xf32, #tpu.memory_space<vmem>>, %arg5: memref<8x256xf32, #tpu.memory_space<vmem>>) attributes {dimension_semantics = [#tpu.dimension_semantics<parallel>], iteration_bounds = array<i64: 1>, scalar_prefetch = 0 : i64, scratch_operands = 0 : i64, tpu.core_type = #tpu.core_type<tc>, window_params = [{transform_indices = @transform_0, window_bounds = array<i64: 8, 256>}, {transform_indices = @transform_1, window_bounds = array<i64: 8, 64>}, {pipeline_mode = #tpu.pipeline_mode<synchronous>, transform_indices = @transform_2, window_bounds = array<i64: 16, 16>}, {pipeline_mode = #tpu.pipeline_mode<synchronous>, transform_indices = @transform_3, window_bounds = array<i64: 8, 16>}, {transform_indices = @transform_4, window_bounds = array<i64: 8, 256>}]} {
    %c0 = arith.constant 0 : index
    %c0_0 = arith.constant 0 : index
    %0 = vector.load %arg1[%c0, %c0_0] : memref<8x256xf32, #tpu.memory_space<vmem>>, vector<8x256xf32>
    %c0_1 = arith.constant 0 : index
    %c0_2 = arith.constant 0 : index
    %1 = vector.load %arg2[%c0_1, %c0_2] : memref<8x64xf32, #tpu.memory_space<vmem>>, vector<8x64xf32>
    %c0_3 = arith.constant 0 : index
    %c0_4 = arith.constant 0 : index
    %2 = vector.load %arg3[%c0_3, %c0_4] : memref<16x16xf32, #tpu.memory_space<vmem>>, vector<16x16xf32>
    %c0_5 = arith.constant 0 : index
    %c0_6 = arith.constant 0 : index
    %3 = vector.load %arg4[%c0_5, %c0_6] : memref<8x16xf32, #tpu.memory_space<vmem>>, vector<8x16xf32>
    %4 = vector.extract_strided_slice %0 {offsets = [0, 0], sizes = [8, 16], strides = [1, 1]} : vector<8x256xf32> to vector<8x16xf32>
    %5 = vector.extract_strided_slice %0 {offsets = [0, 16], sizes = [8, 16], strides = [1, 1]} : vector<8x256xf32> to vector<8x16xf32>
    %cst = arith.constant dense<0.000000e+00> : vector<8x16xf32>
    %6 = tpu.matmul %4, %2, %cst {dimension_numbers = #tpu.dot_dimension_numbers<[1], [0], [0], [1], [0, 0, 1, 1], [], []>} : vector<8x16xf32>, vector<16x16xf32>, vector<8x16xf32> -> vector<8x16xf32>
    %cst_7 = arith.constant dense<0.000000e+00> : vector<8x16xf32>
    %7 = tpu.matmul %5, %2, %cst_7 {dimension_numbers = #tpu.dot_dimension_numbers<[1], [0], [0], [1], [0, 0, 1, 1], [], []>} : vector<8x16xf32>, vector<16x16xf32>, vector<8x16xf32> -> vector<8x16xf32>
    %8 = arith.addf %6, %7 : vector<8x16xf32>
    %9 = vector.extract_strided_slice %1 {offsets = [0, 0], sizes = [8, 8], strides = [1, 1]} : vector<8x64xf32> to vector<8x8xf32>
    %cst_8 = arith.constant dense<0.000000e+00> : vector<8x16xf32>
    %10 = tpu.matmul %9, %3, %cst_8 {dimension_numbers = #tpu.dot_dimension_numbers<[1], [0], [0], [1], [0, 0, 1, 1], [], []>} : vector<8x8xf32>, vector<8x16xf32>, vector<8x16xf32> -> vector<8x16xf32>
    %cst_9 = arith.constant 4.000000e-05 : f32
    %11 = vector.broadcast %cst_9 : f32 to vector<8x16xf32>
    %12 = arith.addf %8, %11 : vector<8x16xf32>
    %13 = arith.divf %10, %12 : vector<8x16xf32>
    %14 = arith.mulf %4, %13 : vector<8x16xf32>
    %15 = arith.mulf %5, %13 : vector<8x16xf32>
    %16 = vector.extract_strided_slice %0 {offsets = [0, 32], sizes = [8, 16], strides = [1, 1]} : vector<8x256xf32> to vector<8x16xf32>
    %17 = vector.extract_strided_slice %0 {offsets = [0, 48], sizes = [8, 16], strides = [1, 1]} : vector<8x256xf32> to vector<8x16xf32>
    %cst_10 = arith.constant dense<0.000000e+00> : vector<8x16xf32>
    %18 = tpu.matmul %16, %2, %cst_10 {dimension_numbers = #tpu.dot_dimension_numbers<[1], [0], [0], [1], [0, 0, 1, 1], [], []>} : vector<8x16xf32>, vector<16x16xf32>, vector<8x16xf32> -> vector<8x16xf32>
    %cst_11 = arith.constant dense<0.000000e+00> : vector<8x16xf32>
    %19 = tpu.matmul %17, %2, %cst_11 {dimension_numbers = #tpu.dot_dimension_numbers<[1], [0], [0], [1], [0, 0, 1, 1], [], []>} : vector<8x16xf32>, vector<16x16xf32>, vector<8x16xf32> -> vector<8x16xf32>
    %20 = arith.addf %18, %19 : vector<8x16xf32>
    %21 = vector.extract_strided_slice %1 {offsets = [0, 8], sizes = [8, 8], strides = [1, 1]} : vector<8x64xf32> to vector<8x8xf32>
    %cst_12 = arith.constant dense<0.000000e+00> : vector<8x16xf32>
    %22 = tpu.matmul %21, %3, %cst_12 {dimension_numbers = #tpu.dot_dimension_numbers<[1], [0], [0], [1], [0, 0, 1, 1], [], []>} : vector<8x8xf32>, vector<8x16xf32>, vector<8x16xf32> -> vector<8x16xf32>
    %cst_13 = arith.constant 4.000000e-05 : f32
    %23 = vector.broadcast %cst_13 : f32 to vector<8x16xf32>
    %24 = arith.addf %20, %23 : vector<8x16xf32>
    %25 = arith.divf %22, %24 : vector<8x16xf32>
    %26 = arith.mulf %16, %25 : vector<8x16xf32>
    %27 = arith.mulf %17, %25 : vector<8x16xf32>
    %28 = vector.extract_strided_slice %0 {offsets = [0, 64], sizes = [8, 16], strides = [1, 1]} : vector<8x256xf32> to vector<8x16xf32>
    %29 = vector.extract_strided_slice %0 {offsets = [0, 80], sizes = [8, 16], strides = [1, 1]} : vector<8x256xf32> to vector<8x16xf32>
    %cst_14 = arith.constant dense<0.000000e+00> : vector<8x16xf32>
    %30 = tpu.matmul %28, %2, %cst_14 {dimension_numbers = #tpu.dot_dimension_numbers<[1], [0], [0], [1], [0, 0, 1, 1], [], []>} : vector<8x16xf32>, vector<16x16xf32>, vector<8x16xf32> -> vector<8x16xf32>
    %cst_15 = arith.constant dense<0.000000e+00> : vector<8x16xf32>
    %31 = tpu.matmul %29, %2, %cst_15 {dimension_numbers = #tpu.dot_dimension_numbers<[1], [0], [0], [1], [0, 0, 1, 1], [], []>} : vector<8x16xf32>, vector<16x16xf32>, vector<8x16xf32> -> vector<8x16xf32>
    %32 = arith.addf %30, %31 : vector<8x16xf32>
    %33 = vector.extract_strided_slice %1 {offsets = [0, 16], sizes = [8, 8], strides = [1, 1]} : vector<8x64xf32> to vector<8x8xf32>
    %cst_16 = arith.constant dense<0.000000e+00> : vector<8x16xf32>
    %34 = tpu.matmul %33, %3, %cst_16 {dimension_numbers = #tpu.dot_dimension_numbers<[1], [0], [0], [1], [0, 0, 1, 1], [], []>} : vector<8x8xf32>, vector<8x16xf32>, vector<8x16xf32> -> vector<8x16xf32>
    %cst_17 = arith.constant 4.000000e-05 : f32
    %35 = vector.broadcast %cst_17 : f32 to vector<8x16xf32>
    %36 = arith.addf %32, %35 : vector<8x16xf32>
    %37 = arith.divf %34, %36 : vector<8x16xf32>
    %38 = arith.mulf %28, %37 : vector<8x16xf32>
    %39 = arith.mulf %29, %37 : vector<8x16xf32>
    %40 = vector.extract_strided_slice %0 {offsets = [0, 96], sizes = [8, 16], strides = [1, 1]} : vector<8x256xf32> to vector<8x16xf32>
    %41 = vector.extract_strided_slice %0 {offsets = [0, 112], sizes = [8, 16], strides = [1, 1]} : vector<8x256xf32> to vector<8x16xf32>
    %cst_18 = arith.constant dense<0.000000e+00> : vector<8x16xf32>
    %42 = tpu.matmul %40, %2, %cst_18 {dimension_numbers = #tpu.dot_dimension_numbers<[1], [0], [0], [1], [0, 0, 1, 1], [], []>} : vector<8x16xf32>, vector<16x16xf32>, vector<8x16xf32> -> vector<8x16xf32>
    %cst_19 = arith.constant dense<0.000000e+00> : vector<8x16xf32>
    %43 = tpu.matmul %41, %2, %cst_19 {dimension_numbers = #tpu.dot_dimension_numbers<[1], [0], [0], [1], [0, 0, 1, 1], [], []>} : vector<8x16xf32>, vector<16x16xf32>, vector<8x16xf32> -> vector<8x16xf32>
    %44 = arith.addf %42, %43 : vector<8x16xf32>
    %45 = vector.extract_strided_slice %1 {offsets = [0, 24], sizes = [8, 8], strides = [1, 1]} : vector<8x64xf32> to vector<8x8xf32>
    %cst_20 = arith.constant dense<0.000000e+00> : vector<8x16xf32>
    %46 = tpu.matmul %45, %3, %cst_20 {dimension_numbers = #tpu.dot_dimension_numbers<[1], [0], [0], [1], [0, 0, 1, 1], [], []>} : vector<8x8xf32>, vector<8x16xf32>, vector<8x16xf32> -> vector<8x16xf32>
    %cst_21 = arith.constant 4.000000e-05 : f32
    %47 = vector.broadcast %cst_21 : f32 to vector<8x16xf32>
    %48 = arith.addf %44, %47 : vector<8x16xf32>
    %49 = arith.divf %46, %48 : vector<8x16xf32>
    %50 = arith.mulf %40, %49 : vector<8x16xf32>
    %51 = arith.mulf %41, %49 : vector<8x16xf32>
    %52 = vector.extract_strided_slice %0 {offsets = [0, 128], sizes = [8, 16], strides = [1, 1]} : vector<8x256xf32> to vector<8x16xf32>
    %53 = vector.extract_strided_slice %0 {offsets = [0, 144], sizes = [8, 16], strides = [1, 1]} : vector<8x256xf32> to vector<8x16xf32>
    %cst_22 = arith.constant dense<0.000000e+00> : vector<8x16xf32>
    %54 = tpu.matmul %52, %2, %cst_22 {dimension_numbers = #tpu.dot_dimension_numbers<[1], [0], [0], [1], [0, 0, 1, 1], [], []>} : vector<8x16xf32>, vector<16x16xf32>, vector<8x16xf32> -> vector<8x16xf32>
    %cst_23 = arith.constant dense<0.000000e+00> : vector<8x16xf32>
    %55 = tpu.matmul %53, %2, %cst_23 {dimension_numbers = #tpu.dot_dimension_numbers<[1], [0], [0], [1], [0, 0, 1, 1], [], []>} : vector<8x16xf32>, vector<16x16xf32>, vector<8x16xf32> -> vector<8x16xf32>
    %56 = arith.addf %54, %55 : vector<8x16xf32>
    %57 = vector.extract_strided_slice %1 {offsets = [0, 32], sizes = [8, 8], strides = [1, 1]} : vector<8x64xf32> to vector<8x8xf32>
    %cst_24 = arith.constant dense<0.000000e+00> : vector<8x16xf32>
    %58 = tpu.matmul %57, %3, %cst_24 {dimension_numbers = #tpu.dot_dimension_numbers<[1], [0], [0], [1], [0, 0, 1, 1], [], []>} : vector<8x8xf32>, vector<8x16xf32>, vector<8x16xf32> -> vector<8x16xf32>
    %cst_25 = arith.constant 4.000000e-05 : f32
    %59 = vector.broadcast %cst_25 : f32 to vector<8x16xf32>
    %60 = arith.addf %56, %59 : vector<8x16xf32>
    %61 = arith.divf %58, %60 : vector<8x16xf32>
    %62 = arith.mulf %52, %61 : vector<8x16xf32>
    %63 = arith.mulf %53, %61 : vector<8x16xf32>
    %64 = vector.extract_strided_slice %0 {offsets = [0, 160], sizes = [8, 16], strides = [1, 1]} : vector<8x256xf32> to vector<8x16xf32>
    %65 = vector.extract_strided_slice %0 {offsets = [0, 176], sizes = [8, 16], strides = [1, 1]} : vector<8x256xf32> to vector<8x16xf32>
    %cst_26 = arith.constant dense<0.000000e+00> : vector<8x16xf32>
    %66 = tpu.matmul %64, %2, %cst_26 {dimension_numbers = #tpu.dot_dimension_numbers<[1], [0], [0], [1], [0, 0, 1, 1], [], []>} : vector<8x16xf32>, vector<16x16xf32>, vector<8x16xf32> -> vector<8x16xf32>
    %cst_27 = arith.constant dense<0.000000e+00> : vector<8x16xf32>
    %67 = tpu.matmul %65, %2, %cst_27 {dimension_numbers = #tpu.dot_dimension_numbers<[1], [0], [0], [1], [0, 0, 1, 1], [], []>} : vector<8x16xf32>, vector<16x16xf32>, vector<8x16xf32> -> vector<8x16xf32>
    %68 = arith.addf %66, %67 : vector<8x16xf32>
    %69 = vector.extract_strided_slice %1 {offsets = [0, 40], sizes = [8, 8], strides = [1, 1]} : vector<8x64xf32> to vector<8x8xf32>
    %cst_28 = arith.constant dense<0.000000e+00> : vector<8x16xf32>
    %70 = tpu.matmul %69, %3, %cst_28 {dimension_numbers = #tpu.dot_dimension_numbers<[1], [0], [0], [1], [0, 0, 1, 1], [], []>} : vector<8x8xf32>, vector<8x16xf32>, vector<8x16xf32> -> vector<8x16xf32>
    %cst_29 = arith.constant 4.000000e-05 : f32
    %71 = vector.broadcast %cst_29 : f32 to vector<8x16xf32>
    %72 = arith.addf %68, %71 : vector<8x16xf32>
    %73 = arith.divf %70, %72 : vector<8x16xf32>
    %74 = arith.mulf %64, %73 : vector<8x16xf32>
    %75 = arith.mulf %65, %73 : vector<8x16xf32>
    %76 = vector.extract_strided_slice %0 {offsets = [0, 192], sizes = [8, 16], strides = [1, 1]} : vector<8x256xf32> to vector<8x16xf32>
    %77 = vector.extract_strided_slice %0 {offsets = [0, 208], sizes = [8, 16], strides = [1, 1]} : vector<8x256xf32> to vector<8x16xf32>
    %cst_30 = arith.constant dense<0.000000e+00> : vector<8x16xf32>
    %78 = tpu.matmul %76, %2, %cst_30 {dimension_numbers = #tpu.dot_dimension_numbers<[1], [0], [0], [1], [0, 0, 1, 1], [], []>} : vector<8x16xf32>, vector<16x16xf32>, vector<8x16xf32> -> vector<8x16xf32>
    %cst_31 = arith.constant dense<0.000000e+00> : vector<8x16xf32>
    %79 = tpu.matmul %77, %2, %cst_31 {dimension_numbers = #tpu.dot_dimension_numbers<[1], [0], [0], [1], [0, 0, 1, 1], [], []>} : vector<8x16xf32>, vector<16x16xf32>, vector<8x16xf32> -> vector<8x16xf32>
    %80 = arith.addf %78, %79 : vector<8x16xf32>
    %81 = vector.extract_strided_slice %1 {offsets = [0, 48], sizes = [8, 8], strides = [1, 1]} : vector<8x64xf32> to vector<8x8xf32>
    %cst_32 = arith.constant dense<0.000000e+00> : vector<8x16xf32>
    %82 = tpu.matmul %81, %3, %cst_32 {dimension_numbers = #tpu.dot_dimension_numbers<[1], [0], [0], [1], [0, 0, 1, 1], [], []>} : vector<8x8xf32>, vector<8x16xf32>, vector<8x16xf32> -> vector<8x16xf32>
    %cst_33 = arith.constant 4.000000e-05 : f32
    %83 = vector.broadcast %cst_33 : f32 to vector<8x16xf32>
    %84 = arith.addf %80, %83 : vector<8x16xf32>
    %85 = arith.divf %82, %84 : vector<8x16xf32>
    %86 = arith.mulf %76, %85 : vector<8x16xf32>
    %87 = arith.mulf %77, %85 : vector<8x16xf32>
    %88 = vector.extract_strided_slice %0 {offsets = [0, 224], sizes = [8, 16], strides = [1, 1]} : vector<8x256xf32> to vector<8x16xf32>
    %89 = vector.extract_strided_slice %0 {offsets = [0, 240], sizes = [8, 16], strides = [1, 1]} : vector<8x256xf32> to vector<8x16xf32>
    %cst_34 = arith.constant dense<0.000000e+00> : vector<8x16xf32>
    %90 = tpu.matmul %88, %2, %cst_34 {dimension_numbers = #tpu.dot_dimension_numbers<[1], [0], [0], [1], [0, 0, 1, 1], [], []>} : vector<8x16xf32>, vector<16x16xf32>, vector<8x16xf32> -> vector<8x16xf32>
    %cst_35 = arith.constant dense<0.000000e+00> : vector<8x16xf32>
    %91 = tpu.matmul %89, %2, %cst_35 {dimension_numbers = #tpu.dot_dimension_numbers<[1], [0], [0], [1], [0, 0, 1, 1], [], []>} : vector<8x16xf32>, vector<16x16xf32>, vector<8x16xf32> -> vector<8x16xf32>
    %92 = arith.addf %90, %91 : vector<8x16xf32>
    %93 = vector.extract_strided_slice %1 {offsets = [0, 56], sizes = [8, 8], strides = [1, 1]} : vector<8x64xf32> to vector<8x8xf32>
    %cst_36 = arith.constant dense<0.000000e+00> : vector<8x16xf32>
    %94 = tpu.matmul %93, %3, %cst_36 {dimension_numbers = #tpu.dot_dimension_numbers<[1], [0], [0], [1], [0, 0, 1, 1], [], []>} : vector<8x8xf32>, vector<8x16xf32>, vector<8x16xf32> -> vector<8x16xf32>
    %cst_37 = arith.constant 4.000000e-05 : f32
    %95 = vector.broadcast %cst_37 : f32 to vector<8x16xf32>
    %96 = arith.addf %92, %95 : vector<8x16xf32>
    %97 = arith.divf %94, %96 : vector<8x16xf32>
    %98 = arith.mulf %88, %97 : vector<8x16xf32>
    %99 = arith.mulf %89, %97 : vector<8x16xf32>
    %100 = tpu.concatenate %14, %15, %26, %27, %38, %39, %50, %51, %62, %63, %74, %75, %86, %87, %98, %99 in 1 : vector<8x16xf32>, vector<8x16xf32>, vector<8x16xf32>, vector<8x16xf32>, vector<8x16xf32>, vector<8x16xf32>, vector<8x16xf32>, vector<8x16xf32>, vector<8x16xf32>, vector<8x16xf32>, vector<8x16xf32>, vector<8x16xf32>, vector<8x16xf32>, vector<8x16xf32>, vector<8x16xf32>, vector<8x16xf32> -> vector<8x256xf32>
    %c0_38 = arith.constant 0 : index
    %c0_39 = arith.constant 0 : index
    %101 = vector.load %arg5[%c0_38, %c0_39] : memref<8x256xf32, #tpu.memory_space<vmem>>, vector<8x256xf32>
    tpu.vector_store %arg5[%c0_38, %c0_39], %100 {strides = array<i32>} : memref<8x256xf32, #tpu.memory_space<vmem>>, vector<8x256xf32>,
    return
  }
  func.func @transform_0(%arg0: i32) -> (i32, i32) {
    %c0_i32 = arith.constant 0 : i32
    %c0_i32_0 = arith.constant 0 : i32
    return %arg0, %c0_i32 : i32, i32
  }
  func.func @transform_1(%arg0: i32) -> (i32, i32) {
    %c0_i32 = arith.constant 0 : i32
    %c0_i32_0 = arith.constant 0 : i32
    return %arg0, %c0_i32 : i32, i32
  }
  func.func @transform_2(%arg0: i32) -> (i32, i32) {
    %c0_i32 = arith.constant 0 : i32
    %c0_i32_0 = arith.constant 0 : i32
    %c0_i32_1 = arith.constant 0 : i32
    return %c0_i32, %c0_i32_0 : i32, i32
  }
  func.func @transform_3(%arg0: i32) -> (i32, i32) {
    %c0_i32 = arith.constant 0 : i32
    %c0_i32_0 = arith.constant 0 : i32
    %c0_i32_1 = arith.constant 0 : i32
    return %c0_i32, %c0_i32_0 : i32, i32
  }
  func.func @transform_4(%arg0: i32) -> (i32, i32) {
    %c0_i32 = arith.constant 0 : i32
    %c0_i32_0 = arith.constant 0 : i32
    return %arg0, %c0_i32 : i32, i32
  }
}

</mosaic_0001>

<bundles_post_ra>
// kernel: tpu_custom_call.1
= control target key start
LH: loop header
LB: loop body
LE: loop exit
PB: predicated region body
PF: predicated region fallthrough
CT: control target
= control target key end

     0   :  { %9 = vsyncpa [#allocation3], 0  ;;  %s2691_s0 = inlined_call_operand.hbm [shape: f32[8,256], index: 0, kind: input, shape index: {}]   ;;  %s2692_s1 = inlined_call_operand.hbm [shape: f32[8,64], index: 1, kind: input, shape index: {}]   ;;  %s2693_s2 = inlined_call_operand.hbm [shape: f32[16,16], index: 2, kind: input, shape index: {}]   ;;  %s2694_s3 = inlined_call_operand.vmem [shape: f32[8,16], index: 3, kind: input, shape index: {}]   ;;  %s2695_s4 = inlined_call_operand.hbm [shape: f32[8,256], index: 4, kind: output, shape index: {}]  }
   0x1   :  { %10 = vsyncpa [#allocation6], 0 }
   0x2   :  { %11 = vsyncpa [#allocation4], 0  ;;  %s2382_s15 = smov [#allocation5]   ;;  %s2383_s17 = smov [#allocation2]  }
   0x3   :  { %s28_s16 = sshll.u32 %s2382_s15, 4  ;;  %s18_s18 = sshll.u32 %s2383_s17, 4  ;;  %s29_s16 = int_to_ptr.vmem [resolvable:$true] %s28_s16  ;;  %s19_s18 = int_to_ptr.vmem [resolvable:$true] %s18_s18 }
   0x4   :  { %s2288_s21 = scalar_lea.hbm %s2692_s1, 128 }
   0x5   :  { %p2289_p0 = scmp.ne.s32.totalorder %s2692_s1, %s2288_s21  ;;  %p2292_p1 = scmp.lt.u32.totalorder %s2288_s21, %s2692_s1 }
   0x7   :  { %p2294_p2 = pnand %p2292_p1, %p2289_p0 }
   0x9   :  { %2297 = shalt.err (!%p2294_p2)
}
   0xa   :  { %s2298_s26 = scalar_lea.vmem %s29_s16, 128  ;;  %p2303_p4 = scmp.lt.s32.totalorder %s29_s16, %s29_s16 }
   0xb   :  { %p2299_p3 = scmp.ne.s32.totalorder %s29_s16, %s2298_s26  ;;  %p2304_p5 = scmp.lt.s32.totalorder %s2298_s26, %s2298_s26 }
   0xd   :  { %p2305_p6 = por %p2304_p5, %p2303_p4 }
   0xf   :  { %p2306_p7 = pnand %p2305_p6, %p2299_p3 }
  0x11   :  { %2309 = shalt.err (!%p2306_p7)
}
  0x12   :  { %31 = dma.hbm_to_vmem [thread:$0]  %s2692_s1, 128, %s29_s16, [#allocation6]  }
  0x13   :  { %s2310_s5 = scalar_lea.hbm %s2691_s0, 256 }
  0x14   :  { %p2311_p8 = scmp.ne.s32.totalorder %s2691_s0, %s2310_s5  ;;  %p2314_p9 = scmp.lt.u32.totalorder %s2310_s5, %s2691_s0 }
  0x16   :  { %p2316_p10 = pnand %p2314_p9, %p2311_p8 }
  0x18   :  { %2319 = shalt.err (!%p2316_p10)
}
  0x19   :  { %s2320_s10 = scalar_lea.vmem %s19_s18, 256  ;;  %p2325_p12 = scmp.lt.s32.totalorder %s19_s18, %s19_s18 }
  0x1a   :  { %p2321_p11 = scmp.ne.s32.totalorder %s19_s18, %s2320_s10  ;;  %p2326_p13 = scmp.lt.s32.totalorder %s2320_s10, %s2320_s10 }
  0x1c   :  { %p2327_p0 = por %p2326_p13, %p2325_p12 }
  0x1e   :  { %p2328_p1 = pnand %p2327_p0, %p2321_p11 }
  0x20   :  { %2331 = shalt.err (!%p2328_p1)
}
  0x21   :  { %21 = dma.hbm_to_vmem [thread:$0]  %s2691_s0, 256, %s19_s18, [#allocation3]  }
  0x22   :  { %s2384_s12 = smov [#allocation7]   ;;  %s2332_s16 = scalar_lea.hbm %s2693_s2, 256 }
  0x23   :  { %s37_s13 = sshll.u32 %s2384_s12, 4  ;;  %p2333_p2 = scmp.ne.s32.totalorder %s2693_s2, %s2332_s16  ;;  %s38_s13 = int_to_ptr.vmem [resolvable:$true] %s37_s13 }
  0x24   :  { %p2336_p3 = scmp.lt.u32.totalorder %s2332_s16, %s2693_s2 }
  0x26   :  { %p2338_p4 = pnand %p2336_p3, %p2333_p2 }
  0x28   :  { %2341 = shalt.err (!%p2338_p4)
}
  0x29   :  { %s2342_s22 = scalar_lea.vmem %s38_s13, 256  ;;  %p2347_p6 = scmp.lt.s32.totalorder %s38_s13, %s38_s13 }
  0x2a   :  { %p2343_p5 = scmp.ne.s32.totalorder %s38_s13, %s2342_s22  ;;  %p2348_p7 = scmp.lt.s32.totalorder %s2342_s22, %s2342_s22 }
  0x2c   :  { %p2349_p8 = por %p2348_p7, %p2347_p6 }
  0x2e   :  { %p2350_p9 = pnand %p2349_p8, %p2343_p5 }
  0x30   :  { %2353 = shalt.err (!%p2350_p9)
}
  0x31   :  { %s2385_s0 = smov 128   ;;  %s2386_s18 = smov 8  }
  0x32   :  { %43 = dma.hbm_to_vmem [thread:$0]  %s2693_s2, 256, %s38_s13, [#allocation6], %s2385_s0, %s2385_s0, %s2386_s18  }
  0x33   :  { %2376 = dma.done.wait [#allocation3], 256  }
  0x34   :  { %2377 = vsyncadd [#allocation3], 4294967040 }
  0x35   :  { %2378 = dma.done.wait [#allocation6], 384  }
  0x36   :  { %2379 = vsyncadd [#allocation6], 4294966912  ;;  %v2387_v0 = vmov 0.0|0.0   ;;  %vm2388_vm0 = vmmov 0   ;;  %v2389_v1 = vmov 0.0   ;;  %v2469_v2 = vld [vmem:[#allocation2] sm:$0xff] }
  0x37   :  { %2204 = vmatprep.subr.bf16.mxu0 %v2387_v0  ;;  %2207 = vmatprep.subr.bf16.mxu1 %v2387_v0  ;;  %s2390_s2 = smov 112   ;;  %s2391_s25 = smov 96   ;;  %v58_v3 = vld [vmem:[#allocation7] sm:$0xff]  ;;  %v59_v4 = vld [vmem:[#allocation7 + $0x8] sm:$0xff]  ;;  %v57_v5 = vld [vmem:[#allocation5] sm:$0xff]  ;;  %vm64_vm1 = vcmask 130048  }
  0x38   :  { %2056 = vmatprep.mubr.msk.f32.mxu0 %vm2388_vm0, %v2389_v1  ;;  %2063 = vmatprep.mubr.msk.f32.mxu1 %vm2388_vm0, %v2389_v1  ;;  %v2475_v6 = vpack.c.bf16 %v59_v4, %v58_v3  ;;  %s2392_s26 = smov 80   ;;  %s2393_s27 = smov 120   ;;  %v2498_v7 = vld [vmem:[#allocation2 + $0x8] sm:$0xff]  ;;  %v2519_v8 = vld [vmem:[%s2694_s3] sm:$0xff]  ;;  %vm209_vm2 = vcmask 64512   ;;  %vm1927_vm3 = vcmask 261120  }
  0x39   :  { %62 = vrot.lane.b32.xlu0 %v2469_v2, %s2390_s2  ;;  %366 = vrot.lane.b32.xlu1 %v2469_v2, %s2391_s25  ;;  %s2394_s28 = smov 64   ;;  %s2395_s29 = smov 48   ;;  %vm1929_vm4 = vcmask 392192   ;;  %vm1931_vm5 = vcmask 523264   ;;  %vm1933_vm6 = vcmask 654336   ;;  %vm1935_vm7 = vcmask 785408  }
  0x3a   :  { %2206 = vmatpush3.bf16.msra.mxu0 %v2475_v6  ;;  %2209 = vmatpush3.bf16.msra.mxu1 %v2475_v6  ;;  %s2396_s30 = smov 16   ;;  %s2397_s5 = smov 104   ;;  %vm1937_vm8 = vcmask 916480  }
  0x3b   :  { %2066 = vmatprep.subr.mxu0 %v2389_v1  ;;  %2210 = vmatprep.subr.bf16.mxu1 %v2387_v0  ;;  %s2398_s6 = smov 32   ;;  %s2399_s7 = smov 88  }
  0x3c   :  { %s2400_s8 = smov 72   ;;  %s2401_s3 = smov [#allocation8]  }
  0x3d   :  { %292 = vrot.lane.b32.xlu0 %v2469_v2, %s2392_s26  ;;  %440 = vrot.lane.b32.xlu1 %v57_v5, %s2393_s27  ;;  %s1954_s1 = sshll.u32 %s2401_s3, 4  ;;  %s1955_s1 = int_to_ptr.vmem [resolvable:$true] %s1954_s1 }
  0x3e   :  { %2064 = vmatmul.mubr.msk.f32.vlgmr.msra.gmra.mrb[0].mxu1 %vm64_vm1, %v2469_v2  ;;  %s2354_s11 = scalar_lea.vmem %s1955_s1, 256  ;;  %p2359_p11 = scmp.lt.s32.totalorder %s1955_s1, %s1955_s1 }
  0x3f   :  { %2212 = vmatpush3.bf16.msra.mxu1 %v2475_v6  ;;  %2075 = vmatprep.mubr.msk.f32.mxu1 %vm2388_vm0, %v2389_v1  ;;  %p2355_p10 = scmp.ne.s32.totalorder %s1955_s1, %s2354_s11  ;;  %p2360_p12 = scmp.lt.s32.totalorder %s2354_s11, %s2354_s11 }
  0x40   :  { %2085 = vmatprep.subr.mxu1 %v2389_v1 }
  0x41   :  { %600 = vrot.lane.b32.xlu1 %v2469_v2, %s2394_s28  ;;  %526 = vrot.lane.b32.xlu0 %v2469_v2, %s2395_s29  ;;  %p2361_p13 = por %p2360_p12, %p2359_p11 }
  0x43   :  { %p2362_p0 = pnand %p2361_p13, %p2355_p10 }
  0x45   :  { %760 = vrot.lane.b32.xlu1 %v2469_v2, %s2396_s30  ;;  %674 = vrot.lane.b32.xlu0 %v57_v5, %s2390_s2 }
  0x49   :  { %908 = vrot.lane.b32.xlu1 %v57_v5, %s2397_s5  ;;  %834 = vrot.lane.b32.xlu0 %v2469_v2, %s2398_s6 }
  0x4d   :  { %995 = vrot.lane.b32.xlu0 %v2498_v7, %s2390_s2  ;;  %1141 = vrot.lane.b32.xlu1 %v57_v5, %s2391_s25 }
  0x51   :  { %1224 = vrot.lane.b32.xlu0 %v2498_v7, %s2392_s26  ;;  %1298 = vrot.lane.b32.xlu1 %v2498_v7, %s2391_s25 }
  0x55   :  { %1372 = vrot.lane.b32.xlu0 %v57_v5, %s2399_s7  ;;  %1458 = vrot.lane.b32.xlu1 %v2498_v7, %s2395_s29 }
  0x59   :  { %1532 = vrot.lane.b32.xlu0 %v2498_v7, %s2394_s28  ;;  %1606 = vrot.lane.b32.xlu1 %v57_v5, %s2392_s26 }
  0x5d   :  { %1766 = vrot.lane.b32.xlu1 %v2498_v7, %s2398_s6  ;;  %1692 = vrot.lane.b32.xlu0 %v2498_v7, %s2396_s30 }
  0x61   :  { %1840 = vrot.lane.b32.xlu0 %v57_v5, %s2400_s8 }
  0xab   :  { %v63_v9 = vpop.permute.xlu0 %62  ;;  %v367_v10 = vpop.permute.xlu1 %366 }
  0xac   :  { %2057 = vmatmul.mubr.msk.f32.vlgmr.msra.gmra.mrb[0].mxu0 %vm64_vm1, %v63_v9 }
  0xad   :  { %2067 = vmatpush3.msra.mxu0 %v2519_v8  ;;  %2068 = vmatprep.mubr.msk.f32.mxu0 %vm2388_vm0, %v2389_v1 }
  0xae   :  { %2213 = vmatprep.subr.bf16.mxu0 %v2387_v0 }
  0xaf   :  { %v293_v11 = vpop.permute.xlu0 %292  ;;  %v441_v12 = vpop.permute.xlu1 %440 }
  0xb0   :  { %2069 = vmatmul.mubr.msk.f32.vlgmr.msra.gmra.mrb[2].mxu0 %vm209_vm2, %v57_v5  ;;  %2076 = vmatmul.mubr.msk.f32.vlgmr.msra.gmra.mrb[2].mxu1 %vm64_vm1, %v293_v11 }
  0xb1   :  { %2215 = vmatpush3.bf16.msra.mxu0 %v2475_v6  ;;  %2082 = vmatprep.mubr.msk.f32.mxu0 %vm2388_vm0, %v2389_v1 }
  0xb2   :  { %2086 = vmatpush3.msra.mxu1 %v2519_v8  ;;  %2087 = vmatprep.mubr.msk.f32.mxu1 %vm2388_vm0, %v2389_v1 }
  0xb3   :  { %2216 = vmatprep.subr.bf16.mxu0 %v2387_v0  ;;  %2219 = vmatprep.subr.bf16.mxu1 %v2387_v0  ;;  %v601_v13 = vpop.permute.xlu1 %600  ;;  %v527_v14 = vpop.permute.xlu0 %526 }
  0xb4   :  { %2083 = vmatmul.mubr.msk.f32.vlgmr.msra.gmra.mrb[4].mxu0 %vm64_vm1, %v367_v10  ;;  %2088 = vmatmul.mubr.msk.f32.vlgmr.msra.gmra.mrb[4].mxu1 %vm209_vm2, %v441_v12 }
  0xb5   :  { %2218 = vmatpush3.bf16.msra.mxu0 %v2475_v6  ;;  %2221 = vmatpush3.bf16.msra.mxu1 %v2475_v6 }
  0xb6   :  { %2094 = vmatprep.mubr.msk.f32.mxu0 %vm2388_vm0, %v2389_v1  ;;  %2104 = vmatprep.subr.mxu0 %v2389_v1 }
  0xb7   :  { %2101 = vmatprep.mubr.msk.f32.mxu1 %vm2388_vm0, %v2389_v1  ;;  %2222 = vmatprep.subr.bf16.mxu1 %v2387_v0  ;;  %v761_v15 = vpop.permute.xlu1 %760  ;;  %v675_v16 = vpop.permute.xlu0 %674 }
  0xb8   :  { %2095 = vmatmul.mubr.msk.f32.vlgmr.msra.gmra.mrb[6].mxu0 %vm64_vm1, %v527_v14  ;;  %2102 = vmatmul.mubr.msk.f32.vlgmr.msra.gmra.mrb[6].mxu1 %vm64_vm1, %v601_v13 }
  0xb9   :  { %2105 = vmatpush3.msra.mxu0 %v2519_v8  ;;  %2224 = vmatpush3.bf16.msra.mxu1 %v2475_v6 }
  0xba   :  { %2106 = vmatprep.mubr.msk.f32.mxu0 %vm2388_vm0, %v2389_v1  ;;  %2225 = vmatprep.subr.bf16.mxu0 %v2387_v0 }
  0xbb   :  { %2113 = vmatprep.mubr.msk.f32.mxu1 %vm2388_vm0, %v2389_v1  ;;  %2123 = vmatprep.subr.mxu1 %v2389_v1  ;;  %v909_v17 = vpop.permute.xlu1 %908  ;;  %v835_v18 = vpop.permute.xlu0 %834 }
  0xbc   :  { %2107 = vmatmul.mubr.msk.f32.vlgmr.msra.gmra.mrb[8].mxu0 %vm209_vm2, %v675_v16  ;;  %2114 = vmatmul.mubr.msk.f32.vlgmr.msra.gmra.mrb[8].mxu1 %vm64_vm1, %v761_v15 }
  0xbd   :  { %2227 = vmatpush3.bf16.msra.mxu0 %v2475_v6  ;;  %2120 = vmatprep.mubr.msk.f32.mxu0 %vm2388_vm0, %v2389_v1 }
  0xbe   :  { %2228 = vmatprep.subr.bf16.mxu0 %v2387_v0  ;;  %2124 = vmatpush3.msra.mxu1 %v2519_v8 }
  0xbf   :  { %2125 = vmatprep.mubr.msk.f32.mxu1 %vm2388_vm0, %v2389_v1  ;;  %2231 = vmatprep.subr.bf16.mxu1 %v2387_v0  ;;  %v996_v19 = vpop.permute.xlu0 %995  ;;  %v1142_v20 = vpop.permute.xlu1 %1141 }
  0xc0   :  { %2121 = vmatmul.mubr.msk.f32.vlgmr.msra.gmra.mrb[10].mxu0 %vm64_vm1, %v835_v18  ;;  %2126 = vmatmul.mubr.msk.f32.vlgmr.msra.gmra.mrb[10].mxu1 %vm209_vm2, %v909_v17 }
  0xc1   :  { %2230 = vmatpush3.bf16.msra.mxu0 %v2475_v6  ;;  %2233 = vmatpush3.bf16.msra.mxu1 %v2475_v6 }
  0xc2   :  { %2132 = vmatprep.mubr.msk.f32.mxu0 %vm2388_vm0, %v2389_v1  ;;  %2142 = vmatprep.subr.mxu0 %v2389_v1 }
  0xc3   :  { %2139 = vmatprep.mubr.msk.f32.mxu1 %vm2388_vm0, %v2389_v1  ;;  %2234 = vmatprep.subr.bf16.mxu1 %v2387_v0  ;;  %v1225_v21 = vpop.permute.xlu0 %1224  ;;  %v1299_v22 = vpop.permute.xlu1 %1298 }
  0xc4   :  { %2133 = vmatmul.mubr.msk.f32.vlgmr.msra.gmra.mrb[12].mxu0 %vm64_vm1, %v996_v19  ;;  %2140 = vmatmul.mubr.msk.f32.vlgmr.msra.gmra.mrb[12].mxu1 %vm64_vm1, %v2498_v7 }
  0xc5   :  { %2143 = vmatpush3.msra.mxu0 %v2519_v8  ;;  %2236 = vmatpush3.bf16.msra.mxu1 %v2475_v6 }
  0xc6   :  { %2144 = vmatprep.mubr.msk.f32.mxu0 %vm2388_vm0, %v2389_v1  ;;  %2237 = vmatprep.subr.bf16.mxu0 %v2387_v0 }
  0xc7   :  { %2151 = vmatprep.mubr.msk.f32.mxu1 %vm2388_vm0, %v2389_v1  ;;  %2161 = vmatprep.subr.mxu1 %v2389_v1  ;;  %v1373_v23 = vpop.permute.xlu0 %1372  ;;  %v1459_v24 = vpop.permute.xlu1 %1458 }
  0xc8   :  { %2145 = vmatmul.mubr.msk.f32.vlgmr.msra.gmra.mrb[14].mxu0 %vm209_vm2, %v1142_v20  ;;  %2152 = vmatmul.mubr.msk.f32.vlgmr.msra.gmra.mrb[14].mxu1 %vm64_vm1, %v1225_v21 }
  0xc9   :  { %2239 = vmatpush3.bf16.msra.mxu0 %v2475_v6  ;;  %2158 = vmatprep.mubr.msk.f32.mxu0 %vm2388_vm0, %v2389_v1 }
  0xca   :  { %2162 = vmatpush3.msra.mxu1 %v2519_v8  ;;  %2163 = vmatprep.mubr.msk.f32.mxu1 %vm2388_vm0, %v2389_v1 }
  0xcb   :  { %2240 = vmatprep.subr.bf16.mxu0 %v2387_v0  ;;  %2243 = vmatprep.subr.bf16.mxu1 %v2387_v0  ;;  %v1533_v25 = vpop.permute.xlu0 %1532  ;;  %v1607_v26 = vpop.permute.xlu1 %1606 }
  0xcc   :  { %2159 = vmatmul.mubr.msk.f32.vlgmr.msra.gmra.mrb[16].mxu0 %vm64_vm1, %v1299_v22  ;;  %2164 = vmatmul.mubr.msk.f32.vlgmr.msra.gmra.mrb[16].mxu1 %vm209_vm2, %v1373_v23 }
  0xcd   :  { %2242 = vmatpush3.bf16.msra.mxu0 %v2475_v6  ;;  %2245 = vmatpush3.bf16.msra.mxu1 %v2475_v6 }
  0xce   :  { %2170 = vmatprep.mubr.msk.f32.mxu0 %vm2388_vm0, %v2389_v1  ;;  %2177 = vmatprep.mubr.msk.f32.mxu1 %vm2388_vm0, %v2389_v1 }
  0xcf   :  { %2180 = vmatprep.subr.mxu0 %v2389_v1  ;;  %2246 = vmatprep.subr.bf16.mxu1 %v2387_v0  ;;  %v1693_v27 = vpop.permute.xlu0 %1692  ;;  %v1767_v28 = vpop.permute.xlu1 %1766 }
  0xd0   :  { %2171 = vmatmul.mubr.msk.f32.vlgmr.msra.gmra.mrb[18].mxu0 %vm64_vm1, %v1459_v24  ;;  %2178 = vmatmul.mubr.msk.f32.vlgmr.msra.gmra.mrb[18].mxu1 %vm64_vm1, %v1533_v25 }
  0xd1   :  { %2181 = vmatpush3.msra.mxu0 %v2519_v8  ;;  %2182 = vmatprep.mubr.msk.f32.mxu0 %vm2388_vm0, %v2389_v1 }
  0xd2   :  { %2249 = vmatprep.subr.bf16.mxu0 %v2387_v0  ;;  %2248 = vmatpush3.bf16.msra.mxu1 %v2475_v6 }
  0xd3   :  { %2189 = vmatprep.mubr.msk.f32.mxu1 %vm2388_vm0, %v2389_v1  ;;  %2199 = vmatprep.subr.mxu1 %v2389_v1  ;;  %v1841_v29 = vpop.permute.xlu0 %1840 }
  0xd4   :  { %2183 = vmatmul.mubr.msk.f32.vlgmr.msra.gmra.mrb[20].mxu0 %vm209_vm2, %v1607_v26 }
  0xd5   :  { %2251 = vmatpush3.bf16.msra.mxu0 %v2475_v6  ;;  %2196 = vmatprep.mubr.msk.f32.mxu0 %vm2388_vm0, %v2389_v1 }
  0xd6   :  { %2190 = vmatmul.mubr.msk.f32.vlgmr.msra.gmra.mrb[20].mxu1 %vm64_vm1, %v1693_v27 }
  0xd7   :  { %2200 = vmatpush3.msra.mxu1 %v2519_v8  ;;  %2201 = vmatprep.mubr.msk.f32.mxu1 %vm2388_vm0, %v2389_v1 }
  0xd8   :  { %2197 = vmatmul.mubr.msk.f32.vlgmr.msra.gmra.mrb[22].mxu0 %vm64_vm1, %v1767_v28 }
  0xda   :  { %2202 = vmatmul.mubr.msk.f32.vlgmr.msra.gmra.mrb[22].mxu1 %vm209_vm2, %v1841_v29 }
 0x111   :  { %v205_v30 = vpop.f32.mrb[0].mxu1 }
 0x112   :  { %v2065_v31 = vpop.f32.mrb[1].mxu1 }
 0x17f   :  { %v133_v32 = vpop.f32.mrb[0].mxu0 }
 0x180   :  { %v206_v33 = vadd.f32 %v205_v30, %v133_v32  ;;  %v2058_v34 = vpop.f32.mrb[1].mxu0 }
 0x182   :  { %v283_v35 = vadd.f32 4e-05, %v206_v33 }
 0x183   :  { %v279_v36 = vpop.f32.mrb[2].mxu0  ;;  %v362_v37 = vpop.f32.mrb[2].mxu1 }
 0x184   :  { %2272 = vrcp.f32 %v283_v35  ;;  %v2070_v38 = vpop.f32.mrb[3].mxu0  ;;  %v2077_v39 = vpop.f32.mrb[3].mxu1 }
 0x187   :  { %v436_v40 = vpop.f32.mrb[4].mxu0  ;;  %v510_v41 = vpop.f32.mrb[4].mxu1 }
 0x188   :  { %v437_v42 = vadd.f32 %v436_v40, %v362_v37  ;;  %v2084_v43 = vpop.f32.mrb[5].mxu0  ;;  %v2089_v44 = vpop.f32.mrb[5].mxu1 }
 0x18a   :  { %v514_v45 = vadd.f32 4e-05, %v437_v42 }
 0x18b   :  { %v596_v46 = vpop.f32.mrb[6].mxu0  ;;  %v670_v47 = vpop.f32.mrb[6].mxu1 }
 0x18c   :  { %2274 = vrcp.f32 %v514_v45  ;;  %v671_v48 = vadd.f32 %v670_v47, %v596_v46  ;;  %v2096_v49 = vpop.f32.mrb[7].mxu0  ;;  %v2103_v50 = vpop.f32.mrb[7].mxu1 }
 0x18e   :  { %v2273_v51 = vpop.eup %2272  ;;  %v748_v52 = vadd.f32 4e-05, %v671_v48 }
 0x18f   :  { %v2627_v53 = vmul.f32 %v2273_v51, %v279_v36  ;;  %v744_v54 = vpop.f32.mrb[8].mxu0  ;;  %v830_v55 = vpop.f32.mrb[8].mxu1 }
 0x190   :  { %2276 = vrcp.f32 %v748_v52  ;;  %v2108_v56 = vpop.f32.mrb[9].mxu0  ;;  %v2115_v57 = vpop.f32.mrb[9].mxu1 }
 0x191   :  { %288 = vrot.lane.b32.xlu1 %v2627_v53, %s2396_s30  ;;  %v286_v56 = vmul.f32 %v2627_v53, %v2469_v2 }
 0x193   :  { %v904_v58 = vpop.f32.mrb[10].mxu0  ;;  %v978_v59 = vpop.f32.mrb[10].mxu1 }
 0x194   :  { %v905_v60 = vadd.f32 %v904_v58, %v830_v55  ;;  %v2122_v61 = vpop.f32.mrb[11].mxu0  ;;  %v2127_v62 = vpop.f32.mrb[11].mxu1 }
 0x196   :  { %v2275_v63 = vpop.eup %2274  ;;  %v982_v0 = vadd.f32 4e-05, %v905_v60 }
 0x197   :  { %v516_v1 = vmul.f32 %v2275_v63, %v510_v41  ;;  %v1065_v3 = vpop.f32.mrb[12].mxu0  ;;  %v1137_v4 = vpop.f32.mrb[12].mxu1 }
 0x198   :  { %2278 = vrcp.f32 %v982_v0  ;;  %v1138_v5 = vadd.f32 %v1137_v4, %v1065_v3  ;;  %v2134_v6 = vpop.f32.mrb[13].mxu0  ;;  %v2141_v8 = vpop.f32.mrb[13].mxu1 }
 0x199   :  { %518 = vrot.lane.b32.xlu1 %v516_v1, %s2398_s6 }
 0x19a   :  { %v2277_v9 = vpop.eup %2276  ;;  %v1215_v10 = vadd.f32 4e-05, %v1138_v5 }
 0x19b   :  { %v750_v11 = vmul.f32 %v2277_v9, %v744_v54  ;;  %v1211_v12 = vpop.f32.mrb[14].mxu0  ;;  %v1294_v13 = vpop.f32.mrb[14].mxu1 }
 0x19c   :  { %2280 = vrcp.f32 %v1215_v10  ;;  %v2146_v14 = vpop.f32.mrb[15].mxu0  ;;  %v2153_v15 = vpop.f32.mrb[15].mxu1 }
 0x19d   :  { %522 = vrot.lane.b32.xlu1 %v516_v1, %s2395_s29 }
 0x19f   :  { %v1368_v16 = vpop.f32.mrb[16].mxu0  ;;  %v1442_v17 = vpop.f32.mrb[16].mxu1 }
 0x1a0   :  { %v1369_v18 = vadd.f32 %v1368_v16, %v1294_v13  ;;  %v2160_v19 = vpop.f32.mrb[17].mxu0  ;;  %v2165_v20 = vpop.f32.mrb[17].mxu1 }
 0x1a1   :  { %752 = vrot.lane.b32.xlu1 %v750_v11, %s2394_s28 }
 0x1a2   :  { %v2279_v21 = vpop.eup %2278  ;;  %v1446_v22 = vadd.f32 4e-05, %v1369_v18 }
 0x1a3   :  { %v984_v23 = vmul.f32 %v2279_v21, %v978_v59  ;;  %v1528_v24 = vpop.f32.mrb[18].mxu0  ;;  %v1602_v25 = vpop.f32.mrb[18].mxu1 }
 0x1a4   :  { %2282 = vrcp.f32 %v1446_v22  ;;  %v1603_v26 = vadd.f32 %v1602_v25, %v1528_v24  ;;  %v2172_v27 = vpop.f32.mrb[19].mxu0  ;;  %v2179_v28 = vpop.f32.mrb[19].mxu1 }
 0x1a5   :  { %756 = vrot.lane.b32.xlu1 %v750_v11, %s2392_s26 }
 0x1a6   :  { %v2281_v29 = vpop.eup %2280  ;;  %v1680_v30 = vadd.f32 4e-05, %v1603_v26 }
 0x1a7   :  { %v2635_v31 = vmul.f32 %v2281_v29, %v1211_v12  ;;  %v1676_v32 = vpop.f32.mrb[20].mxu0 }
 0x1a8   :  { %2284 = vrcp.f32 %v1680_v30  ;;  %v2184_v33 = vpop.f32.mrb[21].mxu0 }
 0x1a9   :  { %986 = vrot.lane.b32.xlu1 %v984_v23, %s2391_s25  ;;  %1220 = vrot.lane.b32.xlu0 %v2635_v31, %s2396_s30  ;;  %v1762_v34 = vpop.f32.mrb[20].mxu1  ;;  %v1218_v15 = vmul.f32 %v2635_v31, %v2498_v7 }
 0x1aa   :  { %v2191_v35 = vpop.f32.mrb[21].mxu1 }
 0x1ab   :  { %v1836_v36 = vpop.f32.mrb[22].mxu0 }
 0x1ac   :  { %v1837_v37 = vadd.f32 %v1836_v36, %v1762_v34  ;;  %v2198_v38 = vpop.f32.mrb[23].mxu0 }
 0x1ad   :  { %990 = vrot.lane.b32.xlu1 %v984_v23, %s2390_s2  ;;  %v1910_v39 = vpop.f32.mrb[22].mxu1 }
 0x1ae   :  { %v2283_v40 = vpop.eup %2282  ;;  %v1914_v41 = vadd.f32 4e-05, %v1837_v37  ;;  %v2203_v42 = vpop.f32.mrb[23].mxu1 }
 0x1af   :  { %v1448_v43 = vmul.f32 %v2283_v40, %v1442_v17 }
 0x1b0   :  { %2286 = vrcp.f32 %v1914_v41 }
 0x1b1   :  { %1450 = vrot.lane.b32.xlu0 %v1448_v43, %s2398_s6 }
 0x1b2   :  { %v2285_v44 = vpop.eup %2284 }
 0x1b3   :  { %v1682_v45 = vmul.f32 %v2285_v44, %v1676_v32 }
 0x1b5   :  { %1454 = vrot.lane.b32.xlu0 %v1448_v43, %s2395_s29 }
 0x1b9   :  { %1684 = vrot.lane.b32.xlu0 %v1682_v45, %s2394_s28 }
 0x1ba   :  { %v2287_v46 = vpop.eup %2286 }
 0x1bb   :  { %v1916_v47 = vmul.f32 %v2287_v46, %v1910_v39 }
 0x1bd   :  { %1688 = vrot.lane.b32.xlu0 %v1682_v45, %s2392_s26 }
 0x1c1   :  { %1918 = vrot.lane.b32.xlu0 %v1916_v47, %s2391_s25 }
 0x1c5   :  { %1922 = vrot.lane.b32.xlu0 %v1916_v47, %s2390_s2 }
 0x203   :  { %v289_v48 = vpop.permute.xlu1 %288 }
 0x204   :  { %v291_v54 = vmul.f32 %v289_v48, %v2469_v2 }
 0x206   :  { %v1926_v60 = vsel %vm64_vm1, %v286_v56, %v291_v54 }
 0x20b   :  { %v519_v49 = vpop.permute.xlu1 %518 }
 0x20c   :  { %v521_v55 = vmul.f32 %v519_v49, %v2469_v2 }
 0x20e   :  { %v1928_v62 = vsel %vm1927_vm3, %v1926_v60, %v521_v55 }
 0x20f   :  { %v523_v50 = vpop.permute.xlu1 %522 }
 0x210   :  { %v525_v57 = vmul.f32 %v523_v50, %v2469_v2 }
 0x212   :  { %v1930_v0 = vsel %vm1929_vm4, %v1928_v62, %v525_v57 }
 0x213   :  { %v753_v51 = vpop.permute.xlu1 %752 }
 0x214   :  { %v755_v58 = vmul.f32 %v753_v51, %v2469_v2 }
 0x216   :  { %v1932_v53 = vsel %vm1931_vm5, %v1930_v0, %v755_v58 }
 0x217   :  { %v757_v52 = vpop.permute.xlu1 %756 }
 0x218   :  { %v759_v61 = vmul.f32 %v757_v52, %v2469_v2 }
 0x21a   :  { %v1934_v4 = vsel %vm1933_vm6, %v1932_v53, %v759_v61 }
 0x21b   :  { %v987_v59 = vpop.permute.xlu1 %986  ;;  %v1221_v1 = vpop.permute.xlu0 %1220 }
 0x21c   :  { %v989_v63 = vmul.f32 %v987_v59, %v2469_v2  ;;  %v1223_v13 = vmul.f32 %v1221_v1, %v2498_v7 }
 0x21e   :  { %v1936_v6 = vsel %vm1935_vm7, %v1934_v4, %v989_v63  ;;  %v1939_v18 = vsel %vm64_vm1, %v1218_v15, %v1223_v13 }
 0x21f   :  { %v991_v3 = vpop.permute.xlu1 %990 }
 0x220   :  { %v993_v5 = vmul.f32 %v991_v3, %v2469_v2 }
 0x222   :  { %v1938_v8 = vsel %vm1937_vm8, %v1936_v6, %v993_v5 }
 0x223   :  { %v1451_v9 = vpop.permute.xlu0 %1450  ;;  %1946 = vst [vmem:[#allocation8] sm:$0xff] %v1938_v8 }
 0x224   :  { %v1453_v14 = vmul.f32 %v1451_v9, %v2498_v7 }
 0x226   :  { %v1940_v20 = vsel %vm1927_vm3, %v1939_v18, %v1453_v14 }
 0x227   :  { %v1455_v10 = vpop.permute.xlu0 %1454 }
 0x228   :  { %v1457_v16 = vmul.f32 %v1455_v10, %v2498_v7 }
 0x22a   :  { %v1941_v22 = vsel %vm1929_vm4, %v1940_v20, %v1457_v16 }
 0x22b   :  { %v1685_v11 = vpop.permute.xlu0 %1684 }
 0x22c   :  { %v1687_v2 = vmul.f32 %v1685_v11, %v2498_v7 }
 0x22e   :  { %v1942_v23 = vsel %vm1931_vm5, %v1941_v22, %v1687_v2 }
 0x22f   :  { %v1689_v12 = vpop.permute.xlu0 %1688 }
 0x230   :  { %v1691_v19 = vmul.f32 %v1689_v12, %v2498_v7 }
 0x232   :  { %v1943_v25 = vsel %vm1933_vm6, %v1942_v23, %v1691_v19 }
 0x233   :  { %v1919_v17 = vpop.permute.xlu0 %1918 }
 0x234   :  { %v1921_v21 = vmul.f32 %v1919_v17, %v2498_v7 }
 0x236   :  { %v1944_v27 = vsel %vm1935_vm7, %v1943_v25, %v1921_v21 }
 0x237   :  { %v1923_v24 = vpop.permute.xlu0 %1922 }
 0x238   :  { %v1925_v26 = vmul.f32 %v1923_v24, %v2498_v7 }
 0x23a   :  { %v1945_v28 = vsel %vm1937_vm8, %v1944_v27, %v1925_v26 }
 0x23b   :  { %1947 = vst [vmem:[#allocation8 + $0x8] sm:$0xff] %v1945_v28 }
 0x23c   :  { %2365 = shalt.err (!%p2362_p0)
}
 0x23d   :  { %s2366_s14 = scalar_lea.hbm %s2695_s4, 256 }
 0x23e   :  { %p2367_p1 = scmp.ne.s32.totalorder %s2695_s4, %s2366_s14  ;;  %p2370_p2 = scmp.lt.u32.totalorder %s2366_s14, %s2695_s4 }
 0x240   :  { %p2372_p3 = pnand %p2370_p2, %p2367_p1 }
 0x242   :  { %2375 = shalt.err (!%p2372_p3)
}
 0x243   :  { %1957 = dma.vmem_to_hbm [thread:$0]  %s1955_s1, 256, %s2695_s4, [#allocation4]  }
 0x244   :  { %2380 = dma.done.wait [#allocation4], 256  }
 0x245   :  { %2381 = vsyncadd [#allocation4], 4294967040 }
 0x246   :  { %1961 = vsyncpa [#allocation3], 1 }
 0x247   :  { %1962 = vsyncpa [#allocation6], 1 }
 0x248   :  { %1963 = vsyncpa [#allocation4], 1 }

</bundles_post_ra>
